<compile_context>
chip_gen: v6e
topology: v6e:2x2x1
jax: 0.10.0
libtpu: 0.0.40
codegen_flags: <defaults>
</compile_context>

<pallas_src>
import functools

import jax
import jax.numpy as jnp
from jax import lax
from jax.experimental import pallas as pl
from jax.experimental.pallas import tpu as pltpu


def _cdiv(a, b):
    return (a + b - 1) // b


def _round_up(a, b):
    return _cdiv(a, b) * b


def _bce_onehot_kernel(x_ref, t_ref, o_ref, *, pack):
    # x_ref: (tn, packed_c) logits, native dtype, upcast on read.
    # t_ref: (tn, pack) int8/int32 absolute packed column of the hot logit.
    # o_ref: (1, 8, packed_c) f32 per-tile partial sums (per vreg position).
    x = x_ref[...].astype(jnp.float32)
    t = t_ref[...].astype(jnp.int32)

    col = lax.broadcasted_iota(jnp.int32, x.shape, 1)
    hit = col == t[:, 0:1]                       # direct compare, no %, //
    for s in range(1, pack):
        hit = hit | (col == t[:, s:s + 1])

    # stable BCE-with-logits vs one-hot: max(x,0) - x*1[hit] + log1p(exp(-|x|))
    loss = (jnp.maximum(x, 0.0)
            - jnp.where(hit, x, 0.0)
            + jnp.log1p(jnp.exp(-jnp.abs(x))))

    tn, pc = loss.shape
    # Sublane-grouped reshape is layout-free; sum(axis=0) is per-vreg VPU adds
    # (no cross-lane XLU work, no big accumulator VMEM traffic in the hot loop).
    o_ref[...] = loss.reshape(tn // 8, 8, pc).sum(axis=0)[None]


def bce_with_logits_loss(logits, target, *, num_classes=64, row_tile=4096):
    """Mean BCE-with-logits loss of `logits` vs one_hot(target, num_classes)."""
    # TODO(synk): weight / pos_weight / non-'mean' reductions not implemented
    # (the module is constructed with PyTorch defaults: all None, reduction='mean').
    N, C = logits.shape
    assert C == num_classes, "logits last dim must equal num_classes"

    # Lane-dense repack: `pack` original rows side by side across the 128 lanes
    # (pack=2 for C=64 -> every vreg fully occupied).
    pack = 128 // C if (C <= 128 and 128 % C == 0) else 1
    packed_c = C * pack

    n_packed = _cdiv(N, pack)
    # tn multiple of 32: covers the int8 target sidecar (32-sublane min tile)
    # and bf16 logits (16-sublane min tile).
    tn = _round_up(min(row_tile, _round_up(n_packed, 32)), 32)
    num_tiles = _cdiv(n_packed, tn)
    n_packed_pad = num_tiles * tn
    n_pad = n_packed_pad * pack

    target_i = target.astype(jnp.int32)
    if n_pad > N:
        logits = jnp.pad(logits, ((0, n_pad - N), (0, 0)))   # zero logits
        target_i = jnp.pad(target_i, (0, n_pad - N))          # target 0, no mask needed

    # Absolute packed column of the one-hot logit for every row; fits in int8
    # whenever packed_c <= 128 (C=64, pack=2 -> max index 127).
    sub_off = (jnp.arange(pack, dtype=jnp.int32) * C)[None, :]
    t_abs = target_i.reshape(n_packed_pad, pack) + sub_off
    t_dtype = jnp.int8 if packed_c <= 128 else jnp.int32
    t_abs = t_abs.astype(t_dtype)

    # Row-major reshape is a free view; no wrapper-side dtype cast of logits.
    x = logits.reshape(n_packed_pad, packed_c)

    kernel = functools.partial(_bce_onehot_kernel, pack=pack)

    cost = pl.CostEstimate(
        flops=10 * n_packed_pad * packed_c,
        transcendentals=2 * n_packed_pad * packed_c,
        bytes_accessed=(n_packed_pad * packed_c * x.dtype.itemsize
                        + n_packed_pad * pack * jnp.dtype(t_dtype).itemsize
                        + num_tiles * 8 * packed_c * 4),
    )

    partials = pl.pallas_call(
        kernel,
        out_shape=jax.ShapeDtypeStruct((num_tiles, 8, packed_c), jnp.float32),
        grid=(num_tiles,),
        in_specs=[
            pl.BlockSpec((tn, packed_c), lambda i: (i, 0)),
            pl.BlockSpec((tn, pack), lambda i: (i, 0)),
        ],
        out_specs=pl.BlockSpec((1, 8, packed_c), lambda i: (i, 0, 0)),
        compiler_params=pltpu.CompilerParams(
            dimension_semantics=("parallel",),
        ),
        cost_estimate=cost,
    )(x, t_abs)

    # Padded rows (zero logits, target 0) contribute exactly log1p(exp(0)) per
    # element; subtract that so the mean is over the TRUE N*C element count.
    pad_loss = jnp.float32((n_pad - N) * C) * jnp.log1p(jnp.exp(jnp.float32(0.0)))
    return (jnp.sum(partials) - pad_loss) * jnp.float32(1.0 / (N * C))


if __name__ == "__main__":
    num_classes = 64

    def reference(logits, target):
        t = jax.nn.one_hot(target, logits.shape[1], dtype=jnp.float32)
        xf = logits.astype(jnp.float32)
        return jnp.mean(jnp.maximum(xf, 0.0) - xf * t + jnp.log1p(jnp.exp(-jnp.abs(xf))))

    key = jax.random.PRNGKey(0)
    k1, k2, k3, k4 = jax.random.split(key, 4)

    # Small shape consistent with the module (batch of logits over 64 classes).
    logits_small = jax.random.normal(k1, (8, num_classes), dtype=jnp.float32)
    target_small = jax.random.randint(k2, (8,), 0, num_classes, dtype=jnp.int32)
    loss_small = jax.block_until_ready(
        bce_with_logits_loss(logits_small, target_small, num_classes=num_classes))
    ref_small = reference(logits_small, target_small)
    assert jnp.allclose(loss_small, ref_small, rtol=1e-5, atol=1e-5), (loss_small, ref_small)

    # Larger ragged batch with a small row_tile: exercises the multi-tile grid,
    # zero padding and the exact padded-loss correction.
    logits_big = jax.random.normal(k3, (3000, num_classes), dtype=jnp.float32)
    target_big = jax.random.randint(k4, (3000,), 0, num_classes, dtype=jnp.int32)
    loss_big = jax.block_until_ready(
        bce_with_logits_loss(logits_big, target_big, num_classes=num_classes, row_tile=256))
    ref_big = reference(logits_big, target_big)
    assert jnp.allclose(loss_big, ref_big, rtol=1e-4, atol=1e-5), (loss_big, ref_big)

    # Same batch, default tiling, bf16 logits streamed natively (in-kernel upcast).
    logits_bf16 = logits_big.astype(jnp.bfloat16)
    loss_bf16 = jax.block_until_ready(
        bce_with_logits_loss(logits_bf16, target_big, num_classes=num_classes))
    ref_bf16 = reference(logits_bf16, target_big)
    assert jnp.allclose(loss_bf16, ref_bf16, rtol=1e-4, atol=1e-4), (loss_bf16, ref_bf16)

    print("KERNEL_OK")
</pallas_src>

<mosaic_0001>
module attributes {stable_mosaic.version = 11 : i64} {
  func.func @_bce_onehot_kernel(%arg0: i32, %arg1: memref<32x128xf32, #tpu.memory_space<vmem>>, %arg2: memref<32x2xi8, #tpu.memory_space<vmem>>, %arg3: memref<1x8x128xf32, #tpu.memory_space<vmem>>) attributes {dimension_semantics = [#tpu.dimension_semantics<parallel>], iteration_bounds = array<i64: 1>, scalar_prefetch = 0 : i64, scratch_operands = 0 : i64, tpu.core_type = #tpu.core_type<tc>, window_params = [{transform_indices = @transform_0, window_bounds = array<i64: 32, 128>}, {transform_indices = @transform_1, window_bounds = array<i64: 32, 2>}, {transform_indices = @transform_2, window_bounds = array<i64: 1, 8, 128>}]} {
    %c0 = arith.constant 0 : index
    %c0_0 = arith.constant 0 : index
    %0 = vector.load %arg1[%c0, %c0_0] : memref<32x128xf32, #tpu.memory_space<vmem>>, vector<32x128xf32>
    %c0_1 = arith.constant 0 : index
    %c0_2 = arith.constant 0 : index
    %1 = vector.load %arg2[%c0_1, %c0_2] : memref<32x2xi8, #tpu.memory_space<vmem>>, vector<32x2xi8>
    %2 = arith.extsi %1 : vector<32x2xi8> to vector<32x2xi32>
    %3 = tpu.iota {dimensions = array<i32: 1>} : vector<32x128xi32>
    %4 = vector.extract_strided_slice %2 {offsets = [0, 0], sizes = [32, 1], strides = [1, 1]} : vector<32x2xi32> to vector<32x1xi32>
    %5 = vector.broadcast %4 : vector<32x1xi32> to vector<32x128xi32>
    %6 = arith.cmpi eq, %3, %5 : vector<32x128xi32>
    %7 = vector.extract_strided_slice %2 {offsets = [0, 1], sizes = [32, 1], strides = [1, 1]} : vector<32x2xi32> to vector<32x1xi32>
    %8 = vector.broadcast %7 : vector<32x1xi32> to vector<32x128xi32>
    %9 = arith.cmpi eq, %3, %8 : vector<32x128xi32>
    %10 = arith.ori %6, %9 : vector<32x128xi1>
    %cst = arith.constant 0.000000e+00 : f32
    %11 = vector.broadcast %cst : f32 to vector<32x128xf32>
    %12 = arith.maximumf %0, %11 : vector<32x128xf32>
    %cst_3 = arith.constant 0.000000e+00 : f32
    %13 = vector.broadcast %cst_3 : f32 to vector<32x128xf32>
    %14 = arith.select %10, %0, %13 : vector<32x128xi1>, vector<32x128xf32>
    %15 = arith.subf %12, %14 : vector<32x128xf32>
    %16 = math.absf %0 : vector<32x128xf32>
    %cst_4 = arith.constant 0.000000e+00 : f32
    %17 = vector.broadcast %cst_4 : f32 to vector<32x128xf32>
    %18 = arith.subf %17, %16 : vector<32x128xf32>
    %19 = math.exp %18 : vector<32x128xf32>
    %20 = math.log1p %19 : vector<32x128xf32>
    %21 = arith.addf %15, %20 : vector<32x128xf32>
    %22 = vector.shape_cast %21 : vector<32x128xf32> to vector<4x8x128xf32>
    %cst_5 = arith.constant dense<0.000000e+00> : vector<8x128xf32>
    %23 = vector.multi_reduction <add>, %22, %cst_5 [0] : vector<4x8x128xf32> to vector<8x128xf32>
    %24 = vector.shape_cast %23 : vector<8x128xf32> to vector<1x8x128xf32>
    %c0_6 = arith.constant 0 : index
    %c0_7 = arith.constant 0 : index
    %c0_8 = arith.constant 0 : index
    %25 = vector.load %arg3[%c0_6, %c0_7, %c0_8] : memref<1x8x128xf32, #tpu.memory_space<vmem>>, vector<1x8x128xf32>
    tpu.vector_store %arg3[%c0_6, %c0_7, %c0_8], %24 {strides = array<i32>} : memref<1x8x128xf32, #tpu.memory_space<vmem>>, vector<1x8x128xf32>,
    return
  }
  func.func @transform_0(%arg0: i32) -> (i32, i32) {
    %c0_i32 = arith.constant 0 : i32
    %c0_i32_0 = arith.constant 0 : i32
    return %arg0, %c0_i32 : i32, i32
  }
  func.func @transform_1(%arg0: i32) -> (i32, i32) {
    %c0_i32 = arith.constant 0 : i32
    %c0_i32_0 = arith.constant 0 : i32
    return %arg0, %c0_i32 : i32, i32
  }
  func.func @transform_2(%arg0: i32) -> (i32, i32, i32) {
    %c0_i32 = arith.constant 0 : i32
    %c0_i32_0 = arith.constant 0 : i32
    %c0_i32_1 = arith.constant 0 : i32
    return %arg0, %c0_i32, %c0_i32_0 : i32, i32, i32
  }
}

</mosaic_0001>

<bundles_post_ra>
// kernel: tpu_custom_call.1
= control target key start
LH: loop header
LB: loop body
LE: loop exit
PB: predicated region body
PF: predicated region fallthrough
CT: control target
= control target key end

     0   :  { %7 = vsyncpa [#allocation3], 0  ;;  %s331_s0 = inlined_call_operand.hbm [shape: f32[32,128], index: 0, kind: input, shape index: {}]   ;;  %s332_s1 = inlined_call_operand.vmem [shape: s8[32,2], index: 1, kind: input, shape index: {}]   ;;  %s333_s2 = inlined_call_operand.hbm [shape: f32[1,8,128], index: 2, kind: output, shape index: {}]  }
   0x1   :  { %8 = vsyncpa [#allocation4], 0  ;;  %s241_s9 = smov [#allocation2]  }
   0x2   :  { %s14_s10 = sshll.u32 %s241_s9, 4  ;;  %s15_s10 = int_to_ptr.vmem [resolvable:$true] %s14_s10 }
   0x3   :  { %s205_s11 = scalar_lea.vmem %s15_s10, 512  ;;  %p210_p1 = scmp.lt.s32.totalorder %s15_s10, %s15_s10 }
   0x4   :  { %p206_p0 = scmp.ne.s32.totalorder %s15_s10, %s205_s11  ;;  %p211_p2 = scmp.lt.s32.totalorder %s205_s11, %s205_s11 }
   0x6   :  { %p212_p3 = por %p211_p2, %p210_p1 }
   0x8   :  { %p213_p4 = pnand %p212_p3, %p206_p0 }
   0xa   :  { %216 = shalt.err (!%p213_p4)
}
   0xb   :  { %s242_s12 = smov 128   ;;  %s243_s13 = smov 8  }
   0xc   :  { %20 = dma.hbm_to_vmem [thread:$0]  %s331_s0, 512, %s15_s10, [#allocation3], %s242_s12, %s242_s12, %s243_s13  }
   0xd   :  { %237 = dma.done.wait [#allocation3], 512  }
   0xe   :  { %238 = vsyncadd [#allocation3], 4294966784  ;;  %v244_v0 = vmov 1   ;;  %v245_v1 = vmov 0   ;;  %v164_v2 = vld [vmem:[%s332_s1] sm:$0xff]   ;;  %v268_v7 = vld [vmem:[#allocation2 + $0x8] sm:$0xff]  ;;  %v38_v31 = vlaneseq }
   0xf   :  { %179 = vset.pattern.permute.xlu1 %v244_v0  ;;  %178 = vset.pattern.permute.xlu0 %v245_v1  ;;  %v165_v3 = vunpack.c.0.s8 %v164_v2  ;;  %v166_v4 = vunpack.c.1.s8 %v164_v2  ;;  %v169_v5 = vunpack.c.2.s8 %v164_v2  ;;  %v170_v6 = vunpack.c.3.s8 %v164_v2  ;;  %v270_v8 = vld [vmem:[#allocation2] sm:$0xff]  ;;  %v272_v9 = vld [vmem:[#allocation2 + $0x10] sm:$0xff]  ;;  %v277_v13 = vld [vmem:[#allocation2 + $0x18] sm:$0xff]  ;;  %s246_s0 = smov [#allocation5]  }
  0x10   :  { %v89_v10 = vand.u32 2147483647, %v268_v7  ;;  %v88_v11 = vand.u32 2147483647, %v270_v8  ;;  %v90_v12 = vand.u32 2147483647, %v272_v9 }
  0x11   :  { %57 = vperm.xlu1 %179, %v165_v3   ;;  %41 = vperm.xlu0 %178, %v165_v3   ;;  %v91_v17 = vand.u32 2147483647, %v277_v13  ;;  %v283_v32 = vand.u32 127, %v38_v31  ;;  %v76_v45 = vmax.f32 %v270_v8, 0.0  ;;  %v77_v51 = vmax.f32 %v268_v7, 0.0  ;;  %s154_s1 = sshll.u32 %s246_s0, 4  ;;  %s155_s1 = int_to_ptr.vmem [resolvable:$true] %s154_s1 }
  0x12   :  { %v93_v14 = vsub.f32 0.0, %v89_v10  ;;  %v92_v15 = vsub.f32 0.0, %v88_v11  ;;  %v94_v16 = vsub.f32 0.0, %v90_v12  ;;  %v78_v52 = vmax.f32 %v272_v9, 0.0  ;;  %s217_s18 = scalar_lea.vmem %s155_s1, 128  ;;  %p222_p6 = scmp.lt.s32.totalorder %s155_s1, %s155_s1 }
  0x13   :  { %v95_v21 = vsub.f32 0.0, %v91_v17  ;;  %p218_p5 = scmp.ne.s32.totalorder %s155_s1, %s217_s18  ;;  %p223_p7 = scmp.lt.s32.totalorder %s217_s18, %s217_s18 }
  0x14   :  { %v98_v18 = vmul.f32 1.442695, %v93_v14  ;;  %v96_v19 = vmul.f32 1.442695, %v92_v15  ;;  %v100_v20 = vmul.f32 1.442695, %v94_v16 }
  0x15   :  { %60 = vperm.xlu1 %179, %v166_v4   ;;  %44 = vperm.xlu0 %178, %v166_v4   ;;  %v102_v22 = vmul.f32 1.442695, %v95_v21  ;;  %p224_p8 = por %p223_p7, %p222_p6 }
  0x16   :  { %181 = vpow2.f32 %v98_v18 }
  0x17   :  { %183 = vpow2.f32 %v96_v19  ;;  %p225_p9 = pnand %p224_p8, %p218_p5 }
  0x18   :  { %185 = vpow2.f32 %v100_v20  ;;  %v79_v20 = vmax.f32 %v277_v13, 0.0 }
  0x19   :  { %63 = vperm.xlu1 %179, %v169_v5   ;;  %47 = vperm.xlu0 %178, %v169_v5   ;;  %187 = vpow2.f32 %v102_v22 }
  0x1d   :  { %66 = vperm.xlu1 %179, %v170_v6   ;;  %50 = vperm.xlu0 %178, %v170_v6  }
  0x21   :  { %180 = vset.pattern.permute.xlu0 %v244_v0 }
  0x23   :  { %v182_v23 = vpop.eup %181 }
  0x24   :  { %v184_v24 = vpop.eup %183  ;;  %v113_v26 = vadd.f32 1.0, %v182_v23  ;;  %v116_v33 = vmul.f32 -0.5, %v182_v23  ;;  %v119_v41 = vand.u32 2147483647, %v182_v23 }
  0x25   :  { %v186_v25 = vpop.eup %185  ;;  %v104_v27 = vadd.f32 1.0, %v184_v24  ;;  %v107_v34 = vmul.f32 -0.5, %v184_v24  ;;  %v110_v48 = vand.u32 2147483647, %v184_v24 }
  0x26   :  { %v122_v28 = vadd.f32 1.0, %v186_v25  ;;  %v280_v29 = vpop.eup %187  ;;  %189 = vlog2.f32 %v113_v26  ;;  %v125_v35 = vmul.f32 -0.5, %v186_v25  ;;  %v117_v38 = vadd.f32 1.0, %v116_v33 }
  0x27   :  { %191 = vlog2.f32 %v104_v27  ;;  %v131_v30 = vadd.f32 1.0, %v280_v29  ;;  %v108_v40 = vadd.f32 1.0, %v107_v34  ;;  %v134_v43 = vmul.f32 -0.5, %v280_v29 }
  0x28   :  { %193 = vlog2.f32 %v122_v28  ;;  %v126_v42 = vadd.f32 1.0, %v125_v35  ;;  %v128_v53 = vand.u32 2147483647, %v186_v25  ;;  %v118_v55 = vmul.f32 %v182_v23, %v117_v38 }
  0x29   :  { %195 = vlog2.f32 %v131_v30  ;;  %v109_v56 = vmul.f32 %v184_v24, %v108_v40  ;;  %vm297_vm6 = vcmp.lt.f32.partialorder %v119_v41, 0.0004427343  ;;  %v135_v59 = vadd.f32 1.0, %v134_v43 }
  0x2a   :  { %v127_v58 = vmul.f32 %v186_v25, %v126_v42  ;;  %vm305_vm7 = vcmp.lt.f32.partialorder %v110_v48, 0.0004427343  ;;  %vm309_vm8 = vcmp.lt.f32.partialorder %v128_v53, 0.0004427343  ;;  %v137_v6 = vand.u32 2147483647, %v280_v29 }
  0x2b   :  { %v136_v10 = vmul.f32 %v280_v29, %v135_v59 }
  0x2c   :  { %vm138_vm12 = vcmp.lt.f32.partialorder %v137_v6, 0.0004427343 }
  0x33   :  { %v190_v39 = vpop.eup %189 }
  0x34   :  { %v192_v44 = vpop.eup %191  ;;  %v115_v54 = vmul.f32 0.6931472, %v190_v39 }
  0x35   :  { %v194_v46 = vpop.eup %193  ;;  %v106_v61 = vmul.f32 0.6931472, %v192_v44 }
  0x36   :  { %v124_v63 = vmul.f32 0.6931472, %v194_v46  ;;  %v196_v0 = vpop.eup %195 }
  0x37   :  { %v112_v11 = vsel %vm305_vm7, %v109_v56, %v106_v61  ;;  %v133_v15 = vmul.f32 0.6931472, %v196_v0 }
  0x38   :  { %v130_v14 = vsel %vm309_vm8, %v127_v58, %v124_v63 }
  0x39   :  { %v139_v23 = vsel %vm138_vm12, %v136_v10, %v133_v15 }
  0x8c   :  { %v58_v36 = vpop.permute.xlu1 %57  ;;  %v42_v37 = vpop.permute.xlu0 %41 }
  0x8d   :  { %vm68_vm0 = vcmp.eq.s32.totalorder %v283_v32, %v58_v36  ;;  %vm52_vm1 = vcmp.eq.s32.totalorder %v283_v32, %v42_v37 }
  0x8e   :  { %vm289_vm2 = vmor %vm52_vm1, %vm68_vm0 }
  0x8f   :  { %v80_v60 = vsel %vm289_vm2, %v270_v8, 0.0  ;;  %v121_v8 = vsel %vm297_vm6, %v118_v55, %v115_v54 }
  0x90   :  { %v61_v49 = vpop.permute.xlu1 %60  ;;  %v45_v50 = vpop.permute.xlu0 %44 }
  0x91   :  { %vm69_vm3 = vcmp.eq.s32.totalorder %v283_v32, %v61_v49  ;;  %vm53_vm4 = vcmp.eq.s32.totalorder %v283_v32, %v45_v50 }
  0x92   :  { %vm73_vm5 = vmor %vm53_vm4, %vm69_vm3 }
  0x93   :  { %v81_v62 = vsel %vm73_vm5, %v268_v7, 0.0  ;;  %v84_v7 = vsub.f32 %v76_v45, %v80_v60 }
  0x94   :  { %v85_v2 = vsub.f32 %v77_v51, %v81_v62  ;;  %v64_v3 = vpop.permute.xlu1 %63  ;;  %v48_v4 = vpop.permute.xlu0 %47 }
  0x95   :  { %vm70_vm9 = vcmp.eq.s32.totalorder %v283_v32, %v64_v3  ;;  %vm54_vm10 = vcmp.eq.s32.totalorder %v283_v32, %v48_v4  ;;  %v140_v21 = vadd.f32 %v112_v11, %v84_v7 }
  0x96   :  { %vm74_vm11 = vmor %vm54_vm10, %vm70_vm9  ;;  %v141_v16 = vadd.f32 %v121_v8, %v85_v2 }
  0x97   :  { %v82_v12 = vsel %vm74_vm11, %v272_v9, 0.0 }
  0x98   :  { %v86_v17 = vsub.f32 %v78_v52, %v82_v12  ;;  %v67_v18 = vpop.permute.xlu1 %66  ;;  %v51_v19 = vpop.permute.xlu0 %50  ;;  %v144_v24 = vadd.f32 %v141_v16, %v140_v21 }
  0x99   :  { %vm71_vm13 = vcmp.eq.s32.totalorder %v283_v32, %v67_v18  ;;  %vm55_vm14 = vcmp.eq.s32.totalorder %v283_v32, %v51_v19 }
  0x9a   :  { %v142_v22 = vadd.f32 %v130_v14, %v86_v17  ;;  %vm75_vm15 = vmor %vm55_vm14, %vm71_vm13 }
  0x9b   :  { %v83_v9 = vsel %vm75_vm15, %v277_v13, 0.0 }
  0x9c   :  { %v87_v25 = vsub.f32 %v79_v20, %v83_v9  ;;  %v145_v27 = vadd.f32 %v144_v24, %v142_v22 }
  0x9e   :  { %v143_v26 = vadd.f32 %v139_v23, %v87_v25 }
  0xa0   :  { %v146_v28 = vadd.f32 %v145_v27, %v143_v26 }
  0xa2   :  { %147 = vst [vmem:[#allocation5] sm:$0xff] %v146_v28 }
  0xa3   :  { %228 = shalt.err (!%p225_p9)
}
  0xa4   :  { %157 = dma.vmem_to_hbm [thread:$0]  %s155_s1, 128, %s333_s2, [#allocation4]  }
  0xa5   :  { %239 = dma.done.wait [#allocation4], 128  }
  0xa6   :  { %240 = vsyncadd [#allocation4], 4294967168 }
  0xa7   :  { %161 = vsyncpa [#allocation3], 1 }
  0xa8   :  { %162 = vsyncpa [#allocation4], 1 }

</bundles_post_ra>
